<compile_context>
chip_gen: v7x
topology: tpu7x:2x2x1
jax: 0.10.0
libtpu: 0.0.40
codegen_flags: <defaults>
</compile_context>

<pallas_src>
import functools

import jax
import jax.numpy as jnp
from jax import lax
from jax.experimental import pallas as pl
from jax.experimental.pallas import tpu as pltpu

_SUBLANES = 8
_LANES = 128
_CHUNK_ROWS = 512                       # rows folded per inner-loop step
_TARGET_BLOCK_BYTES = 2 * 1024 * 1024   # ~2 MiB of DMA per input per grid step
_VMEM_LIMIT_BYTES = 32 * 1024 * 1024


def _sublane_multiple(dtype):
    # Minimum second-minor tile: 8 rows (32-bit), 16 (16-bit), 32 (8-bit).
    return _SUBLANES * max(1, 4 // jnp.dtype(dtype).itemsize)


def _tversky_sums_kernel(x_ref, t_ref, out_ref, *, chunk_rows, n_chunks):
    """Accumulates [sum(x*t), sum(x), sum(t)] into a resident (3, 8, 128) block."""

    @pl.when(pl.program_id(0) == 0)
    def _init():
        out_ref[...] = jnp.zeros_like(out_ref)

    def body(c, carry):
        s_xt, s_x, s_t = carry
        r0 = pl.multiple_of(c * chunk_rows, chunk_rows)
        x = x_ref[pl.ds(r0, chunk_rows), :].astype(jnp.float32)
        t = t_ref[pl.ds(r0, chunk_rows), :].astype(jnp.float32)
        xt = x * t
        # Leading-axis (VPU-only) folds down to one (8, 128) vreg per stream;
        # intermediates stay chunk-sized (never block-sized).
        s_xt = s_xt + jnp.sum(xt.reshape(-1, _SUBLANES, _LANES), axis=0)
        s_x = s_x + jnp.sum(x.reshape(-1, _SUBLANES, _LANES), axis=0)
        s_t = s_t + jnp.sum(t.reshape(-1, _SUBLANES, _LANES), axis=0)
        return s_xt, s_x, s_t

    zero = jnp.zeros((_SUBLANES, _LANES), jnp.float32)
    s_xt, s_x, s_t = lax.fori_loop(0, n_chunks, body, (zero, zero, zero))

    out_ref[0, :, :] += s_xt
    out_ref[1, :, :] += s_x
    out_ref[2, :, :] += s_t


def tversky_loss(inputs, targets, alpha=0.7, beta=0.3, smooth=1.0):
    """Pallas implementation of TverskyLoss.forward (returns a scalar f32)."""
    x = jnp.ravel(inputs)
    t = jnp.ravel(targets)
    n = x.shape[0]
    lane_rows, lane_rem = divmod(n, _LANES)

    # ---- static tiling decisions -----------------------------------------
    row_multiple = max(_sublane_multiple(x.dtype), _sublane_multiple(t.dtype))
    itemsize = max(jnp.dtype(x.dtype).itemsize, jnp.dtype(t.dtype).itemsize)
    max_block_rows = max(_CHUNK_ROWS, _TARGET_BLOCK_BYTES // (_LANES * itemsize))
    max_block_rows -= max_block_rows % _CHUNK_ROWS

    block_rows = chunk_rows = 0
    if lane_rows >= max_block_rows:
        block_rows, chunk_rows = max_block_rows, _CHUNK_ROWS
    else:
        for g in (512, 256, 128, 64, 32, 16, 8):
            if g >= row_multiple and lane_rows >= g:
                block_rows = (lane_rows // g) * g
                chunk_rows = g
                break
    full_blocks = lane_rows // block_rows if block_rows else 0

    s_xt = jnp.float32(0.0)
    s_x = jnp.float32(0.0)
    s_t = jnp.float32(0.0)

    tail_start = 0
    if full_blocks > 0:
        main_elems = lane_rows * _LANES
        if lane_rem == 0:
            # Free reshape view of the flattened inputs -- no padded HBM copy.
            x2 = x.reshape(lane_rows, _LANES)
            t2 = t.reshape(lane_rows, _LANES)
        else:
            # TODO(synk): for hot, large inputs with n % 128 != 0, pass the flat
            # array and mask the last block in-kernel instead of slicing here.
            x2 = x[:main_elems].reshape(lane_rows, _LANES)
            t2 = t[:main_elems].reshape(lane_rows, _LANES)

        covered_rows = full_blocks * block_rows
        covered_elems = covered_rows * _LANES
        kernel = functools.partial(
            _tversky_sums_kernel,
            chunk_rows=chunk_rows,
            n_chunks=block_rows // chunk_rows,
        )
        in_map = lambda i: (i, 0)
        # NOTE: once blocks are >= 2 MiB, pipeline_mode=pl.Buffered(3) on the
        # input specs is a small optional extra (kept off for portability).
        partials = pl.pallas_call(
            kernel,
            out_shape=jax.ShapeDtypeStruct((3, _SUBLANES, _LANES), jnp.float32),
            grid_spec=pltpu.PrefetchScalarGridSpec(
                num_scalar_prefetch=0,
                grid=(full_blocks,),
                in_specs=[
                    pl.BlockSpec((block_rows, _LANES), in_map),
                    pl.BlockSpec((block_rows, _LANES), in_map),
                ],
                out_specs=pl.BlockSpec(
                    (3, _SUBLANES, _LANES), lambda i: (0, 0, 0)),
            ),
            compiler_params=pltpu.CompilerParams(
                dimension_semantics=("arbitrary",),
                vmem_limit_bytes=_VMEM_LIMIT_BYTES,
            ),
            cost_estimate=pl.CostEstimate(
                flops=4 * covered_elems,  # 1 mul + 3 adds per element
                transcendentals=0,
                bytes_accessed=(covered_elems
                                * (x.dtype.itemsize + t.dtype.itemsize)
                                + 3 * _SUBLANES * _LANES * 4),
            ),
        )(x2, t2)

        sums = jnp.sum(partials, axis=(1, 2))  # (3,) = [S_xt, S_x, S_t]
        s_xt += sums[0]
        s_x += sums[1]
        s_t += sums[2]

        if covered_rows < lane_rows:
            # Row remainder (< one block): small end-slice, summed in plain JAX.
            xr = x2[covered_rows:, :].astype(jnp.float32)
            tr = t2[covered_rows:, :].astype(jnp.float32)
            s_xt += jnp.sum(xr * tr)
            s_x += jnp.sum(xr)
            s_t += jnp.sum(tr)
        tail_start = main_elems

    if tail_start < n:
        # Lane remainder (< 128 elements), or everything for tiny inputs.
        x_tail = x[tail_start:].astype(jnp.float32)
        t_tail = t[tail_start:].astype(jnp.float32)
        s_xt += jnp.sum(x_tail * t_tail)
        s_x += jnp.sum(x_tail)
        s_t += jnp.sum(t_tail)

    tp = s_xt
    fp = s_x - s_xt
    fn = s_t - s_xt
    tversky = (tp + smooth) / (tp + alpha * fp + beta * fn + smooth)
    return jnp.float32(1.0) - tversky


def _reference_tversky(inputs, targets, alpha=0.7, beta=0.3, smooth=1.0):
    x = inputs.reshape(-1).astype(jnp.float32)
    t = targets.reshape(-1).astype(jnp.float32)
    tp = jnp.sum(x * t)
    fp = jnp.sum((1.0 - t) * x)
    fn = jnp.sum(t * (1.0 - x))
    tversky = (tp + smooth) / (tp + alpha * fp + beta * fn + smooth)
    return 1.0 - tversky


if __name__ == "__main__":
    key = jax.random.PRNGKey(0)

    def _make(shape, k):
        k1, k2 = jax.random.split(k)
        preds = jax.nn.sigmoid(jax.random.normal(k1, shape, dtype=jnp.float32))
        tgts = (jax.random.uniform(k2, shape) > 0.5).astype(jnp.float32)
        return preds, tgts

    k0, k1, k2 = jax.random.split(key, 3)

    # Primary case: NCHW-like prediction / target maps (the loss flattens them).
    inputs, targets = _make((2, 4, 16, 16), k0)
    loss = jax.block_until_ready(tversky_loss(inputs, targets))
    ref = _reference_tversky(inputs, targets)
    assert jnp.allclose(loss, ref, atol=1e-5, rtol=1e-5), (loss, ref)

    # Unaligned element count: exercises the row/lane tail paths (no pad copy).
    xu, tu = _make((3, 5, 7, 11), k1)
    lu = jax.block_until_ready(tversky_loss(xu, tu))
    ru = _reference_tversky(xu, tu)
    assert jnp.allclose(lu, ru, atol=1e-5, rtol=1e-5), (lu, ru)

    # Larger case: exercises the multi-block grid + in-kernel chunk loop.
    xb, tb = _make((8, 8, 128, 128), k2)
    lb = jax.block_until_ready(tversky_loss(xb, tb))
    rb = _reference_tversky(xb, tb)
    assert jnp.allclose(lb, rb, atol=1e-4, rtol=1e-4), (lb, rb)

    print("KERNEL_OK")
</pallas_src>

<mosaic_0001>
module attributes {stable_mosaic.version = 11 : i64} {
  func.func @_tversky_sums_kernel(%arg0: i32, %arg1: memref<16x128xf32, #tpu.memory_space<vmem>>, %arg2: memref<16x128xf32, #tpu.memory_space<vmem>>, %arg3: memref<3x8x128xf32, #tpu.memory_space<vmem>>) attributes {dimension_semantics = [#tpu.dimension_semantics<arbitrary>], iteration_bounds = array<i64: 1>, scalar_prefetch = 0 : i64, scratch_operands = 0 : i64, tpu.core_type = #tpu.core_type<tc>, window_params = [{transform_indices = @transform_0, window_bounds = array<i64: 16, 128>}, {transform_indices = @transform_1, window_bounds = array<i64: 16, 128>}, {pipeline_mode = #tpu.pipeline_mode<synchronous>, transform_indices = @transform_2, window_bounds = array<i64: 3, 8, 128>}]} {
    %c0_i32 = arith.constant 0 : i32
    %0 = arith.cmpi eq, %arg0, %c0_i32 : i32
    %1 = arith.extui %0 : i1 to i32
    %c0_i32_0 = arith.constant 0 : i32
    %2 = arith.cmpi ne, %1, %c0_i32_0 : i32
    scf.if %2 {
      %cst_22 = arith.constant 0.000000e+00 : f32
      %38 = vector.broadcast %cst_22 : f32 to vector<3x8x128xf32>
      %c0_23 = arith.constant 0 : index
      %c0_24 = arith.constant 0 : index
      %c0_25 = arith.constant 0 : index
      %39 = vector.load %arg3[%c0_23, %c0_24, %c0_25] : memref<3x8x128xf32, #tpu.memory_space<vmem>>, vector<3x8x128xf32>
      tpu.vector_store %arg3[%c0_23, %c0_24, %c0_25], %38 {strides = array<i32>} : memref<3x8x128xf32, #tpu.memory_space<vmem>>, vector<3x8x128xf32>,
    } else {
    }
    %cst = arith.constant 0.000000e+00 : f32
    %3 = vector.broadcast %cst : f32 to vector<8x128xf32>
    %c0_i32_1 = arith.constant 0 : i32
    %c16_i32 = arith.constant 16 : i32
    %4 = arith.muli %c0_i32_1, %c16_i32 : i32
    %5 = tpu.assume_multiple %4, 16 : i32
    %6 = arith.index_cast %5 : i32 to index
    %c0 = arith.constant 0 : index
    %7 = vector.load %arg1[%6, %c0] : memref<16x128xf32, #tpu.memory_space<vmem>>, vector<16x128xf32>
    %8 = arith.index_cast %5 : i32 to index
    %c0_2 = arith.constant 0 : index
    %9 = vector.load %arg2[%8, %c0_2] : memref<16x128xf32, #tpu.memory_space<vmem>>, vector<16x128xf32>
    %10 = arith.mulf %7, %9 : vector<16x128xf32>
    %11 = vector.shape_cast %10 : vector<16x128xf32> to vector<2x8x128xf32>
    %cst_3 = arith.constant dense<0.000000e+00> : vector<8x128xf32>
    %12 = vector.multi_reduction <add>, %11, %cst_3 [0] : vector<2x8x128xf32> to vector<8x128xf32>
    %13 = arith.addf %3, %12 : vector<8x128xf32>
    %14 = vector.shape_cast %7 : vector<16x128xf32> to vector<2x8x128xf32>
    %cst_4 = arith.constant dense<0.000000e+00> : vector<8x128xf32>
    %15 = vector.multi_reduction <add>, %14, %cst_4 [0] : vector<2x8x128xf32> to vector<8x128xf32>
    %16 = arith.addf %3, %15 : vector<8x128xf32>
    %17 = vector.shape_cast %9 : vector<16x128xf32> to vector<2x8x128xf32>
    %cst_5 = arith.constant dense<0.000000e+00> : vector<8x128xf32>
    %18 = vector.multi_reduction <add>, %17, %cst_5 [0] : vector<2x8x128xf32> to vector<8x128xf32>
    %19 = arith.addf %3, %18 : vector<8x128xf32>
    %c1_i32 = arith.constant 1 : i32
    %c0_6 = arith.constant 0 : index
    %c0_7 = arith.constant 0 : index
    %c0_8 = arith.constant 0 : index
    %20 = vector.load %arg3[%c0_6, %c0_7, %c0_8] : memref<3x8x128xf32, #tpu.memory_space<vmem>>, vector<1x8x128xf32>
    %21 = vector.shape_cast %20 : vector<1x8x128xf32> to vector<8x128xf32>
    %22 = arith.addf %21, %13 : vector<8x128xf32>
    %c0_9 = arith.constant 0 : index
    %c0_10 = arith.constant 0 : index
    %c0_11 = arith.constant 0 : index
    %23 = vector.load %arg3[%c0_9, %c0_10, %c0_11] : memref<3x8x128xf32, #tpu.memory_space<vmem>>, vector<1x8x128xf32>
    %24 = vector.shape_cast %23 : vector<1x8x128xf32> to vector<8x128xf32>
    %25 = vector.shape_cast %22 : vector<8x128xf32> to vector<1x8x128xf32>
    tpu.vector_store %arg3[%c0_9, %c0_10, %c0_11], %25 {strides = array<i32>} : memref<3x8x128xf32, #tpu.memory_space<vmem>>, vector<1x8x128xf32>,
    %c1 = arith.constant 1 : index
    %c0_12 = arith.constant 0 : index
    %c0_13 = arith.constant 0 : index
    %26 = vector.load %arg3[%c1, %c0_12, %c0_13] : memref<3x8x128xf32, #tpu.memory_space<vmem>>, vector<1x8x128xf32>
    %27 = vector.shape_cast %26 : vector<1x8x128xf32> to vector<8x128xf32>
    %28 = arith.addf %27, %16 : vector<8x128xf32>
    %c1_14 = arith.constant 1 : index
    %c0_15 = arith.constant 0 : index
    %c0_16 = arith.constant 0 : index
    %29 = vector.load %arg3[%c1_14, %c0_15, %c0_16] : memref<3x8x128xf32, #tpu.memory_space<vmem>>, vector<1x8x128xf32>
    %30 = vector.shape_cast %29 : vector<1x8x128xf32> to vector<8x128xf32>
    %31 = vector.shape_cast %28 : vector<8x128xf32> to vector<1x8x128xf32>
    tpu.vector_store %arg3[%c1_14, %c0_15, %c0_16], %31 {strides = array<i32>} : memref<3x8x128xf32, #tpu.memory_space<vmem>>, vector<1x8x128xf32>,
    %c2 = arith.constant 2 : index
    %c0_17 = arith.constant 0 : index
    %c0_18 = arith.constant 0 : index
    %32 = vector.load %arg3[%c2, %c0_17, %c0_18] : memref<3x8x128xf32, #tpu.memory_space<vmem>>, vector<1x8x128xf32>
    %33 = vector.shape_cast %32 : vector<1x8x128xf32> to vector<8x128xf32>
    %34 = arith.addf %33, %19 : vector<8x128xf32>
    %c2_19 = arith.constant 2 : index
    %c0_20 = arith.constant 0 : index
    %c0_21 = arith.constant 0 : index
    %35 = vector.load %arg3[%c2_19, %c0_20, %c0_21] : memref<3x8x128xf32, #tpu.memory_space<vmem>>, vector<1x8x128xf32>
    %36 = vector.shape_cast %35 : vector<1x8x128xf32> to vector<8x128xf32>
    %37 = vector.shape_cast %34 : vector<8x128xf32> to vector<1x8x128xf32>
    tpu.vector_store %arg3[%c2_19, %c0_20, %c0_21], %37 {strides = array<i32>} : memref<3x8x128xf32, #tpu.memory_space<vmem>>, vector<1x8x128xf32>,
    return
  }
  func.func @transform_0(%arg0: i32) -> (i32, i32) {
    %c0_i32 = arith.constant 0 : i32
    %c0_i32_0 = arith.constant 0 : i32
    return %arg0, %c0_i32 : i32, i32
  }
  func.func @transform_1(%arg0: i32) -> (i32, i32) {
    %c0_i32 = arith.constant 0 : i32
    %c0_i32_0 = arith.constant 0 : i32
    return %arg0, %c0_i32 : i32, i32
  }
  func.func @transform_2(%arg0: i32) -> (i32, i32, i32) {
    %c0_i32 = arith.constant 0 : i32
    %c0_i32_0 = arith.constant 0 : i32
    %c0_i32_1 = arith.constant 0 : i32
    %c0_i32_2 = arith.constant 0 : i32
    return %c0_i32, %c0_i32_0, %c0_i32_1 : i32, i32, i32
  }
}

</mosaic_0001>

<bundles_post_ra>
// kernel: tpu_custom_call.1
= control target key start
LH: loop header
LB: loop body
LE: loop exit
PB: predicated region body
PF: predicated region fallthrough
CT: control target
= control target key end

     0   :  { %7 = vsyncpa [#allocation3], 0  ;;  %s231_s0 = inlined_call_operand.hbm [shape: f32[16,128], index: 0, kind: input, shape index: {}]   ;;  %s232_s1 = inlined_call_operand.hbm [shape: f32[16,128], index: 1, kind: input, shape index: {}]   ;;  %s233_s2 = inlined_call_operand.hbm [shape: f32[3,8,128], index: 2, kind: output, shape index: {}]  }
   0x1   :  { %8 = vsyncpa [#allocation6], 0 }
   0x2   :  { %9 = vsyncpa [#allocation4], 0  ;;  %s166_s9 = smov [#allocation2]   ;;  %s94_s13 = scalar_lea.hbm %s231_s0, 256 }
   0x3   :  { %s15_s10 = sshll.u32 %s166_s9, 4  ;;  %p95_p0 = scmp.ne.s32.totalorder %s231_s0, %s94_s13  ;;  %s16_s10 = int_to_ptr.vmem [resolvable:$true] %s15_s10 }
   0x4   :  { %p98_p1 = scmp.lt.u32.totalorder %s94_s13, %s231_s0 }
   0x6   :  { %p100_p2 = pnand %p98_p1, %p95_p0 }
   0x8   :  { %103 = shalt.err (!%p100_p2)
}
   0x9   :  { %s104_s18 = scalar_lea.vmem %s16_s10, 256  ;;  %p109_p4 = scmp.lt.s32.totalorder %s16_s10, %s16_s10 }
   0xa   :  { %p105_p3 = scmp.ne.s32.totalorder %s16_s10, %s104_s18  ;;  %p110_p5 = scmp.lt.s32.totalorder %s104_s18, %s104_s18 }
   0xc   :  { %p111_p6 = por %p110_p5, %p109_p4 }
   0xe   :  { %p112_p7 = pnand %p111_p6, %p105_p3 }
  0x10   :  { %115 = shalt.err (!%p112_p7)
}
  0x11   :  { %s167_s19 = smov 128   ;;  %s168_s20 = smov 8  }
  0x12   :  { %21 = dma.hbm_to_vmem [thread:$0]  %s231_s0, 256, %s16_s10, [#allocation3], %s167_s19, %s167_s19, %s168_s20  }
  0x13   :  { %s169_s23 = smov [#allocation5]   ;;  %s116_s27 = scalar_lea.hbm %s232_s1, 256 }
  0x14   :  { %s27_s24 = sshll.u32 %s169_s23, 4  ;;  %p117_p8 = scmp.ne.s32.totalorder %s232_s1, %s116_s27  ;;  %s28_s24 = int_to_ptr.vmem [resolvable:$true] %s27_s24 }
  0x15   :  { %p120_p9 = scmp.lt.u32.totalorder %s116_s27, %s232_s1 }
  0x17   :  { %p122_p10 = pnand %p120_p9, %p117_p8 }
  0x19   :  { %125 = shalt.err (!%p122_p10)
}
  0x1a   :  { %s126_s4 = scalar_lea.vmem %s28_s24, 256  ;;  %p131_p12 = scmp.lt.s32.totalorder %s28_s24, %s28_s24 }
  0x1b   :  { %p127_p11 = scmp.ne.s32.totalorder %s28_s24, %s126_s4  ;;  %p132_p13 = scmp.lt.s32.totalorder %s126_s4, %s126_s4 }
  0x1d   :  { %p133_p0 = por %p132_p13, %p131_p12 }
  0x1f   :  { %p134_p1 = pnand %p133_p0, %p127_p11 }
  0x21   :  { %137 = shalt.err (!%p134_p1)
}
  0x22   :  { %33 = dma.hbm_to_vmem [thread:$0]  %s232_s1, 256, %s28_s24, [#allocation6], %s167_s19, %s167_s19, %s168_s20  }
  0x23   :  { %160 = dma.done.wait [#allocation3], 256  }
  0x24   :  { %161 = vsyncadd [#allocation3], 4294967040 }
  0x25   :  { %162 = dma.done.wait [#allocation6], 256  }
  0x26   :  { %163 = vsyncadd [#allocation6], 4294967040  ;;  %v47_v0 = vld [vmem:[#allocation2] sm:$0xff]  ;;  %v48_v1 = vld [vmem:[#allocation2 + $0x8] sm:$0xff]  ;;  %s170_s6 = smov [#allocation7]  }
  0x27   :  { %v49_v2 = vld [vmem:[#allocation5] sm:$0xff]  ;;  %v50_v3 = vld [vmem:[#allocation5 + $0x8] sm:$0xff]  ;;  %v55_v5 = vadd.f32 %v48_v1, %v47_v0  ;;  %s75_s7 = sshll.u32 %s170_s6, 4  ;;  %s76_s7 = int_to_ptr.vmem [resolvable:$true] %s75_s7 }
  0x28   :  { %v51_v4 = vmul.f32 %v49_v2, %v47_v0  ;;  %v52_v6 = vmul.f32 %v50_v3, %v48_v1  ;;  %v57_v7 = vadd.f32 %v50_v3, %v49_v2  ;;  %s138_s1 = scalar_lea.vmem %s76_s7, 384  ;;  %p143_p3 = scmp.lt.s32.totalorder %s76_s7, %s76_s7 }
  0x29   :  { %65 = vst [vmem:[#allocation7 + $0x8] sm:$0xff] %v55_v5  ;;  %p139_p2 = scmp.ne.s32.totalorder %s76_s7, %s138_s1  ;;  %p144_p4 = scmp.lt.s32.totalorder %s138_s1, %s138_s1 }
  0x2a   :  { %v53_v8 = vadd.f32 %v52_v6, %v51_v4  ;;  %69 = vst [vmem:[#allocation7 + $0x10] sm:$0xff] %v57_v7 }
  0x2b   :  { %p145_p5 = por %p144_p4, %p143_p3 }
  0x2c   :  { %61 = vst [vmem:[#allocation7] sm:$0xff] %v53_v8 }
  0x2d   :  { %p146_p6 = pnand %p145_p5, %p139_p2 }
  0x2f   :  { %149 = shalt.err (!%p146_p6)
}
  0x30   :  { %s150_s10 = scalar_lea.hbm %s233_s2, 384 }
  0x31   :  { %p151_p7 = scmp.ne.s32.totalorder %s233_s2, %s150_s10  ;;  %p154_p8 = scmp.lt.u32.totalorder %s150_s10, %s233_s2 }
  0x33   :  { %p156_p9 = pnand %p154_p8, %p151_p7 }
  0x35   :  { %159 = shalt.err (!%p156_p9)
}
  0x36   :  { %81 = dma.vmem_to_hbm [thread:$0]  %s76_s7, 384, %s233_s2, [#allocation4], %s167_s19, %s167_s19, %s168_s20  }
  0x37   :  { %164 = dma.done.wait [#allocation4], 384  }
  0x38   :  { %165 = vsyncadd [#allocation4], 4294966912 }
  0x39   :  { %85 = vsyncpa [#allocation3], 1 }
  0x3a   :  { %86 = vsyncpa [#allocation6], 1 }
  0x3b   :  { %87 = vsyncpa [#allocation4], 1 }

</bundles_post_ra>
